<compile_context>
chip_gen: v5e
topology: v5e:2x2
jax: 0.10.0
libtpu: 0.0.40
codegen_flags: <defaults>
</compile_context>

<pallas_src>
import math

import jax
import jax.numpy as jnp
import numpy as np
from jax.experimental import pallas as pl
from jax.experimental.pallas import tpu as pltpu

# Per-HW-tile mask classification codes (host-computed, scalar-prefetched to SMEM).
CODE_ALL_ZERO, CODE_ALL_ONE, CODE_MIXED = 0, 1, 2


# ----------------------------- Pallas kernel --------------------------------
def _cropout_kernel(codes_smem, mask_ref, noised_ref, cover_ref, out_ref):
    """codes_smem: (hw_blocks,) int32 SMEM ref; only drives the index_maps.
    mask_ref:     (1, tile_hw) mask block (image dtype) -- always the TRUE mask
                  for the current HW tile, resident across the inner NC axis.
    noised/cover/out: (tile_nc, tile_hw) lane-dense tiles.

    For ALL_ZERO tiles the noised block index is redirected to (0, 0) (DMA is
    skipped after the first tile of a run); the mask is all-zero there so the
    stale data is never selected.  Symmetrically for cover on ALL_ONE tiles."""
    del codes_smem
    keep = mask_ref[...] != 0          # (1, tile_hw) bool; broadcasts over sublanes
    out_ref[...] = jnp.where(keep, noised_ref[...], cover_ref[...])


# --------------------------- tiling / hw queries ----------------------------
def _num_tensorcores():
    """Best-effort TensorCore-per-chip count (v7x: 2, v5e/v6e: 1)."""
    try:
        info = pltpu.get_tpu_info()
        for attr in ("num_cores", "core_count", "num_tensorcores",
                     "tensorcore_count", "cores_per_chip", "num_cores_per_chip"):
            v = getattr(info, attr, None)
            if isinstance(v, int) and v > 0:
                return v
    except Exception:
        pass
    try:
        v = getattr(jax.local_devices()[0], "num_cores", None)
        if isinstance(v, int) and v > 0:
            return v
    except Exception:
        pass
    return 1


def _choose_tiles(NC, HW, itemsize, n_cores=1,
                  target_block_bytes=4 << 20, min_block_bytes=1 << 20):
    """Pick (tile_nc, tile_hw) obeying the (8,128) rule with dtype-aware sublanes."""
    LANE = 128
    SUB = 8 * max(1, 4 // max(1, itemsize))   # 8 for f32, 16 for bf16, 32 for int8

    tile_hw = HW
    lane_ok = (HW % LANE == 0)
    # TODO(synk): when HW % 128 != 0 we fall back to a single full-HW block
    # (legal, but vregs are partially filled); padding HW to 128 would make the
    # stores fully lane-dense at the cost of extra HBM traffic for the pad.

    # Sublane (NC) dim: full NC, or a multiple of SUB sized for ~4 MiB blocks.
    rows_fit = max(1, target_block_bytes // max(1, tile_hw * itemsize))
    if NC <= SUB or NC <= rows_fit:
        tile_nc = NC
    else:
        tile_nc = min(NC, max(SUB, (rows_fit // SUB) * SUB))

    if lane_ok:
        # Shrink HW if a single block is still over budget (tiny NC, huge HW).
        while (tile_nc * tile_hw * itemsize > target_block_bytes
               and tile_hw % 2 == 0 and (tile_hw // 2) % LANE == 0):
            tile_hw //= 2
        # Split HW further (up to ~8 blocks) so the host-side ALL_ZERO/ALL_ONE
        # classification has enough granularity to skip DMAs for untouched
        # tiles, while keeping each per-input block >= ~1 MiB (roofline knee).
        while (pl.cdiv(HW, tile_hw) < 8
               and tile_hw % 2 == 0 and (tile_hw // 2) % LANE == 0
               and tile_nc * (tile_hw // 2) * itemsize >= min_block_bytes):
            tile_hw //= 2

    # Megacore (v7x only): if everything collapsed into a single grid step,
    # split NC so both TensorCores get work.  Skipped on 1-TC chips (v5e/v6e).
    if (n_cores > 1
            and pl.cdiv(NC, tile_nc) * pl.cdiv(HW, tile_hw) < n_cores
            and tile_nc == NC and NC % (2 * SUB) == 0):
        tile_nc = NC // 2

    return tile_nc, tile_hw


def _classify_hw_tiles(mask_flat, tile_hw):
    """Per HW-tile code: ALL_ZERO / ALL_ONE / MIXED (depends only on the HW tile,
    since the mask broadcasts over the N*C rows)."""
    HW = mask_flat.shape[0]
    n_blocks = -(-HW // tile_hw)
    codes = np.full((n_blocks,), CODE_MIXED, dtype=np.int32)
    for j in range(n_blocks):
        seg = mask_flat[j * tile_hw:(j + 1) * tile_hw]
        if not seg.any():
            codes[j] = CODE_ALL_ZERO
        elif seg.all():
            codes[j] = CODE_ALL_ONE
    return codes


# --------------------------------- blend -------------------------------------
def cropout_blend(noised, cover, mask_hw, *, tile_nc=None, tile_hw=None):
    """noised, cover: (N, C, H, W). mask_hw: (H, W) host array, 1 inside crop rects."""
    assert noised.shape == cover.shape
    N, C, H, W = noised.shape
    NC, HW = N * C, H * W

    itemsize = np.dtype(noised.dtype).itemsize
    n_cores = _num_tensorcores()
    auto_nc, auto_hw = _choose_tiles(NC, HW, itemsize, n_cores)
    tile_nc = tile_nc or auto_nc
    tile_hw = tile_hw or auto_hw

    nc_blocks = pl.cdiv(NC, tile_nc)
    hw_blocks = pl.cdiv(HW, tile_hw)
    grid = (hw_blocks, nc_blocks)            # HW outer, NC inner -> mask resident

    # Host-side mask + per-tile sparsity classification.
    mask_flat = np.asarray(mask_hw, dtype=np.float32).reshape(HW)
    codes = _classify_hw_tiles(mask_flat, tile_hw)
    codes_dev = jnp.asarray(codes)                                # SMEM prefetch
    m = jnp.asarray(mask_flat.astype(noised.dtype)).reshape(1, HW)  # image dtype H2D

    x = noised.reshape(NC, HW)
    y = cover.reshape(NC, HW)

    # Data-dependent index maps (scalar-prefetched codes): redirect to block
    # (0,0) when the tile does not need that input, so Pallas skips the re-DMA.
    def _mask_map(j, i, codes_ref):
        del i, codes_ref
        return (0, j)

    def _noised_map(j, i, codes_ref):
        need = (codes_ref[j] != CODE_ALL_ZERO).astype(jnp.int32)
        return (i * need, j * need)

    def _cover_map(j, i, codes_ref):
        need = (codes_ref[j] != CODE_ALL_ONE).astype(jnp.int32)
        return (i * need, j * need)

    def _out_map(j, i, codes_ref):
        del codes_ref
        return (i, j)

    mask_spec = pl.BlockSpec((1, tile_hw), _mask_map)
    noised_spec = pl.BlockSpec((tile_nc, tile_hw), _noised_map)
    cover_spec = pl.BlockSpec((tile_nc, tile_hw), _cover_map)
    out_spec = pl.BlockSpec((tile_nc, tile_hw), _out_map)

    # Explicit VMEM budget: 3 streams x 2 buffers x block + mask double-buffer,
    # +20% headroom.  ~30 MiB for 4 MiB blocks -> safe on v5e/v6e (128 MiB) and
    # v7x (64 MiB physical).
    block_bytes = tile_nc * tile_hw * itemsize
    vmem_limit = int(1.2 * (3 * 2 * block_bytes + 2 * tile_hw * itemsize)) + (1 << 20)
    vmem_limit = max(vmem_limit, 4 << 20)

    cost = pl.CostEstimate(
        flops=2 * NC * HW,
        transcendentals=0,
        bytes_accessed=3 * NC * HW * itemsize + HW * itemsize)

    out = pl.pallas_call(
        _cropout_kernel,
        out_shape=jax.ShapeDtypeStruct((NC, HW), noised.dtype),
        grid_spec=pltpu.PrefetchScalarGridSpec(
            num_scalar_prefetch=1,
            grid=grid,
            in_specs=[mask_spec, noised_spec, cover_spec],
            out_specs=out_spec,
        ),
        compiler_params=pltpu.CompilerParams(
            dimension_semantics=("parallel", "arbitrary"),
            vmem_limit_bytes=vmem_limit),
        cost_estimate=cost,
    )(codes_dev, m, x, y)
    return out.reshape(N, C, H, W)


# ------------------------ host-side rectangle sampling ----------------------
def _get_random_rectangle_inside(rng, H, W, height_ratio_range, width_ratio_range):
    h_ratio = float(rng.uniform(height_ratio_range[0], height_ratio_range[1]))
    w_ratio = float(rng.uniform(width_ratio_range[0], width_ratio_range[1]))
    rem_h = max(1, int(round(h_ratio * H)))
    rem_w = max(1, int(round(w_ratio * W)))
    h_start = 0 if rem_h == H else int(rng.integers(0, H - rem_h))
    w_start = 0 if rem_w == W else int(rng.integers(0, W - rem_w))
    ratio = (rem_h * rem_w) / (H * W)
    return h_start, h_start + rem_h, w_start, w_start + rem_w, ratio


def sample_rectangles(rng, H, W, height_ratio_range, width_ratio_range,
                      min_required_block_portion):
    """Mirrors the module's `while sum_attacked < min_required_block_portion`
    loop on the host (pure numpy, no device round-trips)."""
    rects = []
    sum_attacked = 0.0
    while sum_attacked < min_required_block_portion:
        hs, he, ws, we, ratio = _get_random_rectangle_inside(
            rng, H, W, height_ratio_range, width_ratio_range)
        sum_attacked += ratio
        rects.append((hs, he, ws, we))
    return rects


def build_mask(H, W, rects):
    """(H, W) float32 host mask: 1 inside any crop rectangle, 0 elsewhere."""
    mask = np.zeros((H, W), dtype=np.float32)
    for hs, he, ws, we in rects:
        mask[hs:he, ws:we] = 1.0
    return mask


def cropout_label(N, H, W, rects, dtype=jnp.float32):
    """(N, 2, H//16, W//16) label, computed on host (tiny, static shapes)."""
    bh, bw = H // 16, W // 16
    label = np.zeros((N, 2, bh, bw), dtype=np.float32)
    label[:, 1, :, :] = 1.0
    for hs, he, ws, we in rects:
        label[:, 0, hs // 16:math.ceil(he / 16), ws // 16:math.ceil(we / 16)] = 1.0
        label[:, 1, hs // 16:math.ceil(he / 16), ws // 16:math.ceil(we / 16)] = 0.0
    return jnp.asarray(label, dtype=dtype)


# --------------------------------- driver ------------------------------------
def cropout_forward(noised, cover, seed, *,
                    height_ratio_range=0.5, width_ratio_range=0.5,
                    min_required_block_portion=0.2,
                    tile_nc=None, tile_hw=None):
    # TODO(synk): the data-dependent host `while` loop over rectangles stays on
    # the host; only the per-pixel blend runs in Pallas.
    N, C, H, W = noised.shape
    rng = np.random.default_rng(seed)
    rects = sample_rectangles(rng, H, W,
                              (8.0 / 256.0, height_ratio_range),
                              (8.0 / 256.0, width_ratio_range),
                              min_required_block_portion)
    mask_hw = build_mask(H, W, rects)
    out = cropout_blend(noised, cover, mask_hw, tile_nc=tile_nc, tile_hw=tile_hw)
    label = cropout_label(N, H, W, rects, dtype=noised.dtype)
    return out, label, rects


def _reference_check(noised, cover, out, rects):
    H, W = noised.shape[2], noised.shape[3]
    mask = build_mask(H, W, rects)
    n = np.asarray(noised).astype(np.float32)
    c = np.asarray(cover).astype(np.float32)
    ref = n * mask + c * (1.0 - mask)
    np.testing.assert_allclose(np.asarray(out).astype(np.float32), ref,
                               rtol=1e-6, atol=1e-6)


if __name__ == "__main__":
    key = jax.random.PRNGKey(0)
    ks = jax.random.split(key, 6)

    # Case 1: f32, small batch (single fused lane-dense block).
    N, C, H, W = 2, 3, 32, 32
    noised = jax.random.normal(ks[0], (N, C, H, W), dtype=jnp.float32)
    cover = jax.random.normal(ks[1], (N, C, H, W), dtype=jnp.float32)
    out, label, rects = cropout_forward(noised, cover, seed=0)
    jax.block_until_ready((out, label))
    _reference_check(noised, cover, out, rects)
    assert label.shape == (N, 2, H // 16, W // 16)

    # Case 2: bf16, NC=16 -> exercises the dtype-aware sublane multiple (SUB=16)
    # and the TC-gated NC split on 2-TensorCore chips.
    N2, C2, H2, W2 = 2, 8, 32, 48
    noised2 = jax.random.normal(ks[2], (N2, C2, H2, W2), dtype=jnp.bfloat16)
    cover2 = jax.random.normal(ks[3], (N2, C2, H2, W2), dtype=jnp.bfloat16)
    out2, label2, rects2 = cropout_forward(noised2, cover2, seed=1)
    jax.block_until_ready((out2, label2))
    _reference_check(noised2, cover2, out2, rects2)
    assert label2.shape == (N2, 2, H2 // 16, W2 // 16)

    # Case 3: forced fine HW tiling (8 blocks of 128 lanes) -> exercises the
    # sparsity path: scalar-prefetched tile codes + data-dependent index_maps
    # that redirect/skip DMAs for ALL_ZERO / ALL_ONE tiles.
    N3, C3, H3, W3 = 2, 4, 32, 32
    noised3 = jax.random.normal(ks[4], (N3, C3, H3, W3), dtype=jnp.float32)
    cover3 = jax.random.normal(ks[5], (N3, C3, H3, W3), dtype=jnp.float32)
    out3, label3, rects3 = cropout_forward(noised3, cover3, seed=2,
                                           tile_nc=8, tile_hw=128)
    jax.block_until_ready((out3, label3))
    _reference_check(noised3, cover3, out3, rects3)
    assert label3.shape == (N3, 2, H3 // 16, W3 // 16)

    print("KERNEL_OK")
</pallas_src>

<mosaic_0001>
module attributes {stable_mosaic.version = 11 : i64} {
  func.func @_cropout_kernel(%arg0: i32, %arg1: i32, %arg2: memref<1xi32, #tpu.memory_space<smem>>, %arg3: memref<1x1024xf32, #tpu.memory_space<vmem>>, %arg4: memref<6x1024xf32, #tpu.memory_space<vmem>>, %arg5: memref<6x1024xf32, #tpu.memory_space<vmem>>, %arg6: memref<6x1024xf32, #tpu.memory_space<vmem>>) attributes {dimension_semantics = [#tpu.dimension_semantics<parallel>, #tpu.dimension_semantics<arbitrary>], iteration_bounds = array<i64: 1, 1>, scalar_prefetch = 1 : i64, scratch_operands = 0 : i64, tpu.core_type = #tpu.core_type<tc>, window_params = [{transform_indices = @transform_0, window_bounds = array<i64: 1, 1024>}, {transform_indices = @transform_1, window_bounds = array<i64: 6, 1024>}, {transform_indices = @transform_2, window_bounds = array<i64: 6, 1024>}, {transform_indices = @transform_3, window_bounds = array<i64: 6, 1024>}]} {
    %c0 = arith.constant 0 : index
    %c0_0 = arith.constant 0 : index
    %0 = vector.load %arg3[%c0, %c0_0] : memref<1x1024xf32, #tpu.memory_space<vmem>>, vector<1x1024xf32>
    %cst = arith.constant 0.000000e+00 : f32
    %1 = vector.broadcast %cst : f32 to vector<1x1024xf32>
    %2 = arith.cmpf one, %0, %1 : vector<1x1024xf32>
    %c0_1 = arith.constant 0 : index
    %c0_2 = arith.constant 0 : index
    %3 = vector.load %arg4[%c0_1, %c0_2] : memref<6x1024xf32, #tpu.memory_space<vmem>>, vector<6x1024xf32>
    %c0_3 = arith.constant 0 : index
    %c0_4 = arith.constant 0 : index
    %4 = vector.load %arg5[%c0_3, %c0_4] : memref<6x1024xf32, #tpu.memory_space<vmem>>, vector<6x1024xf32>
    %5 = vector.shape_cast %2 : vector<1x1024xi1> to vector<1x1024xi1>
    %6 = vector.broadcast %5 : vector<1x1024xi1> to vector<6x1024xi1>
    %7 = arith.select %6, %3, %4 : vector<6x1024xi1>, vector<6x1024xf32>
    %c0_5 = arith.constant 0 : index
    %c0_6 = arith.constant 0 : index
    %8 = vector.load %arg6[%c0_5, %c0_6] : memref<6x1024xf32, #tpu.memory_space<vmem>>, vector<6x1024xf32>
    tpu.vector_store %arg6[%c0_5, %c0_6], %7 {strides = array<i32>} : memref<6x1024xf32, #tpu.memory_space<vmem>>, vector<6x1024xf32>,
    return
  }
  func.func @transform_0(%arg0: i32, %arg1: i32, %arg2: memref<1xi32, #tpu.memory_space<smem>>) -> (i32, i32) {
    %c0_i32 = arith.constant 0 : i32
    %c0_i32_0 = arith.constant 0 : i32
    return %c0_i32, %arg0 : i32, i32
  }
  func.func @transform_1(%arg0: i32, %arg1: i32, %arg2: memref<1xi32, #tpu.memory_space<smem>>) -> (i32, i32) {
    %0 = arith.index_cast %arg0 : i32 to index
    %1 = memref.load %arg2[%0] : memref<1xi32, #tpu.memory_space<smem>>
    %c0_i32 = arith.constant 0 : i32
    %2 = arith.cmpi ne, %1, %c0_i32 : i32
    %3 = arith.extui %2 : i1 to i32
    %4 = arith.muli %arg1, %3 : i32
    %5 = arith.muli %arg0, %3 : i32
    %c0_i32_0 = arith.constant 0 : i32
    return %4, %5 : i32, i32
  }
  func.func @transform_2(%arg0: i32, %arg1: i32, %arg2: memref<1xi32, #tpu.memory_space<smem>>) -> (i32, i32) {
    %0 = arith.index_cast %arg0 : i32 to index
    %1 = memref.load %arg2[%0] : memref<1xi32, #tpu.memory_space<smem>>
    %c1_i32 = arith.constant 1 : i32
    %2 = arith.cmpi ne, %1, %c1_i32 : i32
    %3 = arith.extui %2 : i1 to i32
    %4 = arith.muli %arg1, %3 : i32
    %5 = arith.muli %arg0, %3 : i32
    %c0_i32 = arith.constant 0 : i32
    return %4, %5 : i32, i32
  }
  func.func @transform_3(%arg0: i32, %arg1: i32, %arg2: memref<1xi32, #tpu.memory_space<smem>>) -> (i32, i32) {
    %c0_i32 = arith.constant 0 : i32
    return %arg1, %arg0 : i32, i32
  }
}

</mosaic_0001>

<bundles_post_ra>
// kernel: tpu_custom_call.1
= control target key start
LH: loop header
LB: loop body
LE: loop exit
PB: predicated region body
PF: predicated region fallthrough
CT: control target
= control target key end

     0   :  { %10 = vsyncpa [#allocation5], 0  ;;  %s343_s0 = inlined_call_operand.<no memory space> [shape: s32[1], index: 0, kind: input, shape index: {}]   ;;  %s344_s1 = inlined_call_operand.hbm [shape: f32[1,1024], index: 1, kind: input, shape index: {}]   ;;  %s345_s2 = inlined_call_operand.hbm [shape: f32[6,1024], index: 2, kind: input, shape index: {}]   ;;  %s346_s3 = inlined_call_operand.hbm [shape: f32[6,1024], index: 3, kind: input, shape index: {}]   ;;  %s347_s4 = inlined_call_operand.hbm [shape: f32[6,1024], index: 4, kind: output, shape index: {}]  }
   0x1   :  { %11 = vsyncpa [#allocation8], 0  ;;  %s39_s17 = sshll.u32 %s345_s2, 4  ;;  %s40_s17 = int_to_ptr.hbm [resolvable:$true] %s39_s17 }
   0x2   :  { %12 = vsyncpa [#allocation6], 0  ;;  %s276_s0 = smov [#allocation7]   ;;  %s18_s21 = sshll.u32 %s344_s1, 4  ;;  %s19_s21 = int_to_ptr.hbm [resolvable:$true] %s18_s21 }
   0x3   :  { %s41_s18 = sshll.u32 %s276_s0, 4  ;;  %s277_s22 = smov [#allocation4]   ;;  %s42_s18 = int_to_ptr.vmem [resolvable:$true] %s41_s18 }
   0x4   :  { %44 = dma.hbm_to_vmem [thread:$0]  %s40_s17, 1024, %s42_s18, [#allocation8]  }
   0x5   :  { %s20_s23 = sshll.u32 %s277_s22, 4  ;;  %s60_s26 = sshll.u32 %s346_s3, 4  ;;  %s21_s23 = int_to_ptr.vmem [resolvable:$true] %s20_s23  ;;  %s61_s26 = int_to_ptr.hbm [resolvable:$true] %s60_s26 }
   0x6   :  { %23 = dma.hbm_to_vmem [thread:$0]  %s19_s21, 128, %s21_s23, [#allocation5]  }
   0x7   :  { %s278_s2 = smov [#allocation9]  }
   0x8   :  { %s62_s27 = sshll.u32 %s278_s2, 4  ;;  %s63_s27 = int_to_ptr.vmem [resolvable:$true] %s62_s27 }
   0x9   :  { %65 = dma.hbm_to_vmem [thread:$0]  %s61_s26, 1024, %s63_s27, [#allocation8]  }
   0xa   :  { %270 = dma.done.wait [#allocation5], 128  }
   0xb   :  { %271 = vsyncadd [#allocation5], 4294967168 }
   0xc   :  { %272 = dma.done.wait [#allocation8], 2048  }
   0xd   :  { %273 = vsyncadd [#allocation8], 4294965248  ;;  %v90_v0 = vld [vmem:[#allocation4] sm:$0xff]  ;;  %v92_v1 = vld [vmem:[#allocation7] sm:$0x3f]  ;;  %v279_v5 = vmov 0  }
   0xe   :  { %vm91_vm0 = vcmp.ne.f32.partialorder %v90_v0, 0.0  ;;  %v100_v2 = vld [vmem:[#allocation9] sm:$0x3f]  ;;  %v93_v3 = vld [vmem:[#allocation7 + $0x8] sm:$0x3f]  ;;  %s280_s1 = smov [#allocation10]  }
   0xf   :  { %v101_v4 = vld [vmem:[#allocation9 + $0x8] sm:$0x3f]  ;;  %v108_v6 = vsel %vm91_vm0, 1, %v279_v5  ;;  %v94_v7 = vld [vmem:[#allocation7 + $0x10] sm:$0x3f]  ;;  %s315_s3 = sshll.u32 %s280_s1, 4  ;;  %s147_s3 = int_to_ptr.vmem [resolvable:$true] %s315_s3 }
  0x10   :  { %v102_v8 = vld [vmem:[#allocation9 + $0x10] sm:$0x3f]  ;;  %v109_v9 = vperm.slane %v108_v6, 0  ;;  %v110_v10 = vperm.slane %v108_v6, 1  ;;  %v111_v11 = vperm.slane %v108_v6, 2  ;;  %v112_v13 = vperm.slane %v108_v6, 3 }
  0x11   :  { %v95_v12 = vld [vmem:[#allocation7 + $0x18] sm:$0x3f]  ;;  %s148_s30 = sshll.u32 %s347_s4, 4  ;;  %v96_v18 = vld [vmem:[#allocation7 + $0x20] sm:$0x3f]  ;;  %v113_v28 = vperm.slane %v108_v6, 4  ;;  %s149_s30 = int_to_ptr.hbm [resolvable:$true] %s148_s30 }
  0x12   :  { %v103_v14 = vld [vmem:[#allocation9 + $0x18] sm:$0x3f]  ;;  %vm117_vm1 = vcmp.eq.s32.totalorder %v109_v9, 1  ;;  %vm320_vm2 = vcmp.eq.s32.totalorder %v110_v10, 1  ;;  %vm324_vm3 = vcmp.eq.s32.totalorder %v111_v11, 1  ;;  %vm328_vm4 = vcmp.eq.s32.totalorder %v112_v13, 1 }
  0x13   :  { %v104_v19 = vld [vmem:[#allocation9 + $0x20] sm:$0x3f]  ;;  %v97_v20 = vld [vmem:[#allocation7 + $0x28] sm:$0x3f]  ;;  %v125_v21 = vsel %vm117_vm1, %v92_v1, %v100_v2  ;;  %v126_v22 = vsel %vm320_vm2, %v93_v3, %v101_v4  ;;  %v127_v23 = vsel %vm324_vm3, %v94_v7, %v102_v8  ;;  %v128_v24 = vsel %vm328_vm4, %v95_v12, %v103_v14  ;;  %v98_v26 = vld [vmem:[#allocation7 + $0x30] sm:$0x3f] }
  0x14   :  { %v105_v25 = vld [vmem:[#allocation9 + $0x28] sm:$0x3f]  ;;  %v106_v27 = vld [vmem:[#allocation9 + $0x30] sm:$0x3f]  ;;  %133 = vst [vmem:[#allocation10] sm:$0x3f] %v125_v21 }
  0x15   :  { %v114_v29 = vperm.slane %v108_v6, 5  ;;  %v115_v30 = vperm.slane %v108_v6, 6  ;;  %v116_v31 = vperm.slane %v108_v6, 7  ;;  %134 = vst [vmem:[#allocation10 + $0x8] sm:$0x3f] %v126_v22  ;;  %vm121_vm5 = vcmp.eq.s32.totalorder %v113_v28, 1 }
  0x16   :  { %v99_v32 = vld [vmem:[#allocation7 + $0x38] sm:$0x3f]  ;;  %135 = vst [vmem:[#allocation10 + $0x10] sm:$0x3f] %v127_v23  ;;  %v129_v34 = vsel %vm121_vm5, %v96_v18, %v104_v19 }
  0x17   :  { %v107_v33 = vld [vmem:[#allocation9 + $0x38] sm:$0x3f]  ;;  %vm122_vm6 = vcmp.eq.s32.totalorder %v114_v29, 1  ;;  %vm123_vm7 = vcmp.eq.s32.totalorder %v115_v30, 1  ;;  %vm124_vm8 = vcmp.eq.s32.totalorder %v116_v31, 1 }
  0x18   :  { %136 = vst [vmem:[#allocation10 + $0x18] sm:$0x3f] %v128_v24  ;;  %v130_v35 = vsel %vm122_vm6, %v97_v20, %v105_v25  ;;  %v131_v36 = vsel %vm123_vm7, %v98_v26, %v106_v27  ;;  %v132_v37 = vsel %vm124_vm8, %v99_v32, %v107_v33 }
  0x19   :  { %137 = vst [vmem:[#allocation10 + $0x20] sm:$0x3f] %v129_v34 }
  0x1a   :  { %138 = vst [vmem:[#allocation10 + $0x28] sm:$0x3f] %v130_v35 }
  0x1b   :  { %139 = vst [vmem:[#allocation10 + $0x30] sm:$0x3f] %v131_v36 }
  0x1c   :  { %140 = vst [vmem:[#allocation10 + $0x38] sm:$0x3f] %v132_v37 }
  0x1d   :  { %151 = dma.vmem_to_hbm [thread:$0]  %s147_s3, 1024, %s149_s30, [#allocation6]  }
  0x1e   :  { %274 = dma.done.wait [#allocation6], 1024  }
  0x1f   :  { %275 = vsyncadd [#allocation6], 4294966272 }
  0x20   :  { %156 = vsyncpa [#allocation5], 1 }
  0x21   :  { %157 = vsyncpa [#allocation8], 1 }
  0x22   :  { %158 = vsyncpa [#allocation6], 1 }

</bundles_post_ra>
